<compile_context>
chip_gen: v7x
topology: tpu7x:2x2x1
jax: 0.10.0
libtpu: 0.0.40
codegen_flags: <defaults>
</compile_context>

<pallas_src>
from typing import NamedTuple, Tuple

import jax
import jax.numpy as jnp
from jax import lax
from jax.experimental import pallas as pl
from jax.experimental.pallas import tpu as pltpu


class _LayerCfg(NamedTuple):
    H: int      # input height
    W: int      # input width
    Cin: int
    Cout: int
    KH: int
    KW: int
    ph: int
    pw: int
    Hout: int
    Wout: int


def _toeplitz_weight(w_hwio, w_in, pw):
    """Fold the KW taps and the W zero-padding into one matmul weight.

    w_hwio: (KH, KW, Cin, Cout)
    Returns T: (KH, W_in*Cin, Wout*Cout) with
      T[kh, wi*Cin + ci, wo*Cout + co] = w[kh, wi-wo+pw, ci, co]
    when 0 <= wi-wo+pw < KW, else 0 (taps landing in the W pad contribute 0).
    """
    kh_, kw_, cin, cout = w_hwio.shape
    wout = w_in + 2 * pw - kw_ + 1
    wi = jnp.arange(w_in)[:, None, None]
    wo = jnp.arange(wout)[None, :, None]
    kw = jnp.arange(kw_)[None, None, :]
    mask = (wi - wo + pw == kw).astype(w_hwio.dtype)          # (W_in, Wout, KW)
    t = jnp.einsum('wok,hkic->hwioc', mask, w_hwio)           # (KH,W,Cin,Wout,Cout)
    return t.reshape(kh_, w_in * cin, wout * cout)


def _make_fused_kernel(cfgs: Tuple[_LayerCfg, ...], nb: int):
    """Fused (pad -> conv -> bias -> ReLU) x L kernel for one batch tile."""
    L = len(cfgs)

    def kernel(*refs):
        x_ref = refs[0]                                   # (nb, H0, W0*Cin0)
        w_refs = [refs[1 + 2 * l] for l in range(L)]      # (KH*W*Cin, Wout*Cout)
        b_refs = [refs[2 + 2 * l] for l in range(L)]      # (1, Wout*Cout)
        o_ref = refs[1 + 2 * L]                           # (nb*Hout_L, Wout_L*Cout_L)
        lhs_refs = refs[2 + 2 * L:]                       # per-layer LHS scratch

        c0 = cfgs[0]
        # Flatten batch into the row (M) axis once; every layer works on
        # (nb*H, W*Cin) slabs from here on.
        xin = x_ref[...].reshape(nb * c0.H, c0.W * c0.Cin)

        for l in range(L):
            c = cfgs[l]
            wc = c.W * c.Cin
            lhs = lhs_refs[l]                             # (nb*Hout, KH*W*Cin)

            # Assemble the KH-folded LHS: lane block kh holds the input rows
            # shifted by (kh - ph); rows that would read the H zero-pad are
            # zero-filled explicitly (only ph rows per image per boundary tap).
            for kh in range(c.KH):
                d = kh - c.ph
                col0, col1 = kh * wc, (kh + 1) * wc
                if d == 0 and c.H == c.Hout:
                    lhs[:, col0:col1] = xin               # one full batch-slab copy
                else:
                    lo = max(0, -d)                       # first valid output row
                    hi = min(c.Hout, c.H - d)             # one past last valid row
                    for n in range(nb):
                        r0 = n * c.Hout
                        if lo > 0:                        # top pad rows
                            lhs[r0:r0 + lo, col0:col1] = jnp.zeros(
                                (lo, wc), jnp.float32)
                        if hi < c.Hout:                   # bottom pad rows
                            lhs[r0 + hi:r0 + c.Hout, col0:col1] = jnp.zeros(
                                (c.Hout - hi, wc), jnp.float32)
                        lhs[r0 + lo:r0 + hi, col0:col1] = xin[
                            n * c.H + lo + d:n * c.H + hi + d, :]

            # Single MXU matmul per layer: (nb*Hout, KH*W*Cin) @ (KH*W*Cin, Wout*Cout)
            acc = jnp.dot(lhs[...], w_refs[l][...],
                          preferred_element_type=jnp.float32)
            bias = jnp.broadcast_to(b_refs[l][...], (nb * c.Hout, c.Wout * c.Cout))
            act = jnp.maximum(acc + bias, 0.0)            # bias + ReLU epilogue

            if l + 1 < L:
                xin = act                                 # stays in registers/VMEM
            else:
                o_ref[...] = act.astype(o_ref.dtype)      # lane-dense (256) store

    return kernel


def prepare_cnn_params(layer_params, input_shape):
    """One-time (eager, outside jit) Toeplitz weight / bias construction."""
    N, C0, H, W = input_shape
    cfgs, toep_ws, biases = [], [], []
    cin, hc, wc = C0, H, W
    for (w_hwio, b, (ph, pw)) in layer_params:
        kh, kw, wcin, cout = w_hwio.shape
        assert wcin == cin
        hout = hc + 2 * ph - kh + 1            # stride 1
        wout = wc + 2 * pw - kw + 1
        cfgs.append(_LayerCfg(hc, wc, cin, cout, kh, kw, ph, pw, hout, wout))
        t = _toeplitz_weight(w_hwio, wc, pw).reshape(kh * wc * cin, wout * cout)
        toep_ws.append(t)
        biases.append(jnp.tile(b, wout).reshape(1, wout * cout))
        cin, hc, wc = cout, hout, wout
    return tuple(cfgs), tuple(toep_ws), tuple(biases)


def cnn_forward(x_nchw, prepared, nb=None):
    """CNN.forward(inputs, channels_last=False): stack of (Conv2d -> ReLU)."""
    cfgs, toep_ws, biases = prepared
    N, C0, H, W = x_nchw.shape
    c0, last = cfgs[0], cfgs[-1]
    assert (H, W, C0) == (c0.H, c0.W, c0.Cin)
    if nb is None:
        nb = N                                  # one batch tile covers everything
    assert N % nb == 0

    # NCHW -> NHWC -> (N, H, W*Cin): each image row becomes one lane vector.
    # (Kept to preserve the module's NCHW contract; downstream consumers that
    #  accept channels-last could skip both wrapper transposes.)
    x = jnp.transpose(x_nchw, (0, 2, 3, 1)).reshape(N, H, W * C0)

    inputs = [x]
    in_specs = [pl.BlockSpec((nb, c0.H, c0.W * c0.Cin), lambda i: (i, 0, 0))]
    for t, bb in zip(toep_ws, biases):
        inputs += [t, bb]
        in_specs += [pl.BlockSpec(t.shape, lambda i: (0, 0)),
                     pl.BlockSpec(bb.shape, lambda i: (0, 0))]

    out_rows = N * last.Hout
    out_cols = last.Wout * last.Cout

    out2 = pl.pallas_call(
        _make_fused_kernel(cfgs, nb),
        out_shape=jax.ShapeDtypeStruct((out_rows, out_cols), x_nchw.dtype),
        grid=(N // nb,),                         # batch tiles; 1 step at N=2
        in_specs=in_specs,
        out_specs=pl.BlockSpec((nb * last.Hout, out_cols), lambda i: (i, 0)),
        scratch_shapes=[
            pltpu.VMEM((nb * c.Hout, c.KH * c.W * c.Cin), jnp.float32)
            for c in cfgs
        ],
        compiler_params=pltpu.CompilerParams(
            dimension_semantics=("parallel",)),
    )(*inputs)

    out = out2.reshape(N, last.Hout, last.Wout, last.Cout)
    return jnp.transpose(out, (0, 3, 1, 2))      # back to NCHW


def _reference_forward(x_nchw, layer_params):
    """Pure-JAX reference (lax.conv) for numerical verification."""
    x = jnp.transpose(x_nchw, (0, 2, 3, 1))
    for (w, b, (ph, pw)) in layer_params:
        y = lax.conv_general_dilated(
            x, w, window_strides=(1, 1),
            padding=((ph, ph), (pw, pw)),
            dimension_numbers=("NHWC", "HWIO", "NHWC"),
        )
        x = jnp.maximum(y + b, 0.0)
    return jnp.transpose(x, (0, 3, 1, 2))


def _init_params(key, features, kernel_size):
    """Deterministic synthetic init (HWIO weight layout)."""
    params = []
    for i in range(len(features) - 1):
        kh, kw = kernel_size[i]
        cin, cout = features[i], features[i + 1]
        key, kw_key, kb_key = jax.random.split(key, 3)
        fan_in = kh * kw * cin
        w = jax.random.normal(kw_key, (kh, kw, cin, cout), jnp.float32) / jnp.sqrt(fan_in)
        b = 0.01 * jax.random.normal(kb_key, (cout,), jnp.float32)
        params.append((w, b, (1, 1)))            # padding=1 per layer
    return params


if __name__ == "__main__":
    key = jax.random.PRNGKey(0)
    key, xkey = jax.random.split(key)

    # Module config (synthetic, small):
    features = [4, 8, 16]
    kernel_size = [(3, 3), (3, 3)]

    # Input: NCHW, batch=2, channels=features[0]=4, spatial 16x16.
    x = jax.random.normal(xkey, (2, 4, 16, 16), jnp.float32)
    params = _init_params(key, features, kernel_size)

    # One-time eager preprocessing (Toeplitz weights / tiled biases).
    prepared = prepare_cnn_params(params, x.shape)

    fwd = jax.jit(lambda inp: cnn_forward(inp, prepared))
    out = jax.block_until_ready(fwd(x))

    ref = _reference_forward(x, params)
    assert out.shape == ref.shape == (2, 16, 16, 16), out.shape
    assert jnp.allclose(out, ref, rtol=1e-4, atol=1e-4), "mismatch vs reference"

    print("KERNEL_OK")
</pallas_src>

<mosaic_0001>
module attributes {stable_mosaic.version = 11 : i64} {
  func.func @kernel(%arg0: i32, %arg1: memref<2x16x64xf32, #tpu.memory_space<vmem>>, %arg2: memref<192x128xf32, #tpu.memory_space<vmem>>, %arg3: memref<1x128xf32, #tpu.memory_space<vmem>>, %arg4: memref<384x256xf32, #tpu.memory_space<vmem>>, %arg5: memref<1x256xf32, #tpu.memory_space<vmem>>, %arg6: memref<32x256xf32, #tpu.memory_space<vmem>>, %arg7: memref<32x192xf32, #tpu.memory_space<vmem>>, %arg8: memref<32x384xf32, #tpu.memory_space<vmem>>) attributes {dimension_semantics = [#tpu.dimension_semantics<parallel>], iteration_bounds = array<i64: 1>, scalar_prefetch = 0 : i64, scratch_operands = 2 : i64, tpu.core_type = #tpu.core_type<tc>, window_params = [{transform_indices = @transform_0, window_bounds = array<i64: 2, 16, 64>}, {pipeline_mode = #tpu.pipeline_mode<synchronous>, transform_indices = @transform_1, window_bounds = array<i64: 192, 128>}, {pipeline_mode = #tpu.pipeline_mode<synchronous>, transform_indices = @transform_2, window_bounds = array<i64: 1, 128>}, {pipeline_mode = #tpu.pipeline_mode<synchronous>, transform_indices = @transform_3, window_bounds = array<i64: 384, 256>}, {pipeline_mode = #tpu.pipeline_mode<synchronous>, transform_indices = @transform_4, window_bounds = array<i64: 1, 256>}, {transform_indices = @transform_5, window_bounds = array<i64: 32, 256>}]} {
    %c0 = arith.constant 0 : index
    %c0_0 = arith.constant 0 : index
    %c0_1 = arith.constant 0 : index
    %0 = vector.load %arg1[%c0, %c0_0, %c0_1] : memref<2x16x64xf32, #tpu.memory_space<vmem>>, vector<2x16x64xf32>
    %1 = vector.shape_cast %0 : vector<2x16x64xf32> to vector<32x64xf32>
    %cst = arith.constant 0.000000e+00 : f32
    %2 = vector.broadcast %cst : f32 to vector<1x64xf32>
    %c0_2 = arith.constant 0 : index
    %c0_3 = arith.constant 0 : index
    %3 = vector.load %arg7[%c0_2, %c0_3] : memref<32x192xf32, #tpu.memory_space<vmem>>, vector<1x64xf32>
    tpu.vector_store %arg7[%c0_2, %c0_3], %2 {strides = array<i32>} : memref<32x192xf32, #tpu.memory_space<vmem>>, vector<1x64xf32>,
    %4 = vector.extract_strided_slice %1 {offsets = [0, 0], sizes = [15, 64], strides = [1, 1]} : vector<32x64xf32> to vector<15x64xf32>
    %c1 = arith.constant 1 : index
    %c0_4 = arith.constant 0 : index
    %5 = vector.load %arg7[%c1, %c0_4] : memref<32x192xf32, #tpu.memory_space<vmem>>, vector<15x64xf32>
    tpu.vector_store %arg7[%c1, %c0_4], %4 {strides = array<i32>} : memref<32x192xf32, #tpu.memory_space<vmem>>, vector<15x64xf32>,
    %cst_5 = arith.constant 0.000000e+00 : f32
    %6 = vector.broadcast %cst_5 : f32 to vector<1x64xf32>
    %c16 = arith.constant 16 : index
    %c0_6 = arith.constant 0 : index
    %7 = vector.load %arg7[%c16, %c0_6] : memref<32x192xf32, #tpu.memory_space<vmem>>, vector<1x64xf32>
    tpu.vector_store %arg7[%c16, %c0_6], %6 {strides = array<i32>} : memref<32x192xf32, #tpu.memory_space<vmem>>, vector<1x64xf32>,
    %8 = vector.extract_strided_slice %1 {offsets = [16, 0], sizes = [15, 64], strides = [1, 1]} : vector<32x64xf32> to vector<15x64xf32>
    %c17 = arith.constant 17 : index
    %c0_7 = arith.constant 0 : index
    %9 = vector.load %arg7[%c17, %c0_7] : memref<32x192xf32, #tpu.memory_space<vmem>>, vector<15x64xf32>
    tpu.vector_store %arg7[%c17, %c0_7], %8 {strides = array<i32>} : memref<32x192xf32, #tpu.memory_space<vmem>>, vector<15x64xf32>,
    %c0_8 = arith.constant 0 : index
    %c64 = arith.constant 64 : index
    %10 = vector.load %arg7[%c0_8, %c64] : memref<32x192xf32, #tpu.memory_space<vmem>>, vector<32x64xf32>
    tpu.vector_store %arg7[%c0_8, %c64], %1 {strides = array<i32>} : memref<32x192xf32, #tpu.memory_space<vmem>>, vector<32x64xf32>,
    %cst_9 = arith.constant 0.000000e+00 : f32
    %11 = vector.broadcast %cst_9 : f32 to vector<1x64xf32>
    %c15 = arith.constant 15 : index
    %c128 = arith.constant 128 : index
    %12 = vector.load %arg7[%c15, %c128] : memref<32x192xf32, #tpu.memory_space<vmem>>, vector<1x64xf32>
    tpu.vector_store %arg7[%c15, %c128], %11 {strides = array<i32>} : memref<32x192xf32, #tpu.memory_space<vmem>>, vector<1x64xf32>,
    %13 = vector.extract_strided_slice %1 {offsets = [1, 0], sizes = [15, 64], strides = [1, 1]} : vector<32x64xf32> to vector<15x64xf32>
    %c0_10 = arith.constant 0 : index
    %c128_11 = arith.constant 128 : index
    %14 = vector.load %arg7[%c0_10, %c128_11] : memref<32x192xf32, #tpu.memory_space<vmem>>, vector<15x64xf32>
    tpu.vector_store %arg7[%c0_10, %c128_11], %13 {strides = array<i32>} : memref<32x192xf32, #tpu.memory_space<vmem>>, vector<15x64xf32>,
    %cst_12 = arith.constant 0.000000e+00 : f32
    %15 = vector.broadcast %cst_12 : f32 to vector<1x64xf32>
    %c31 = arith.constant 31 : index
    %c128_13 = arith.constant 128 : index
    %16 = vector.load %arg7[%c31, %c128_13] : memref<32x192xf32, #tpu.memory_space<vmem>>, vector<1x64xf32>
    tpu.vector_store %arg7[%c31, %c128_13], %15 {strides = array<i32>} : memref<32x192xf32, #tpu.memory_space<vmem>>, vector<1x64xf32>,
    %17 = vector.extract_strided_slice %1 {offsets = [17, 0], sizes = [15, 64], strides = [1, 1]} : vector<32x64xf32> to vector<15x64xf32>
    %c16_14 = arith.constant 16 : index
    %c128_15 = arith.constant 128 : index
    %18 = vector.load %arg7[%c16_14, %c128_15] : memref<32x192xf32, #tpu.memory_space<vmem>>, vector<15x64xf32>
    tpu.vector_store %arg7[%c16_14, %c128_15], %17 {strides = array<i32>} : memref<32x192xf32, #tpu.memory_space<vmem>>, vector<15x64xf32>,
    %c0_16 = arith.constant 0 : index
    %c0_17 = arith.constant 0 : index
    %19 = vector.load %arg7[%c0_16, %c0_17] : memref<32x192xf32, #tpu.memory_space<vmem>>, vector<32x192xf32>
    %c0_18 = arith.constant 0 : index
    %c0_19 = arith.constant 0 : index
    %20 = vector.load %arg2[%c0_18, %c0_19] : memref<192x128xf32, #tpu.memory_space<vmem>>, vector<192x128xf32>
    %cst_20 = arith.constant dense<0.000000e+00> : vector<32x128xf32>
    %21 = tpu.matmul %19, %20, %cst_20 {dimension_numbers = #tpu.dot_dimension_numbers<[1], [0], [0], [1], [0, 0, 1, 1], [], []>} : vector<32x192xf32>, vector<192x128xf32>, vector<32x128xf32> -> vector<32x128xf32>
    %c0_21 = arith.constant 0 : index
    %c0_22 = arith.constant 0 : index
    %22 = vector.load %arg3[%c0_21, %c0_22] : memref<1x128xf32, #tpu.memory_space<vmem>>, vector<1x128xf32>
    %23 = vector.shape_cast %22 : vector<1x128xf32> to vector<1x128xf32>
    %24 = vector.broadcast %23 : vector<1x128xf32> to vector<32x128xf32>
    %25 = arith.addf %21, %24 : vector<32x128xf32>
    %cst_23 = arith.constant 0.000000e+00 : f32
    %26 = vector.broadcast %cst_23 : f32 to vector<32x128xf32>
    %27 = arith.maximumf %25, %26 : vector<32x128xf32>
    %cst_24 = arith.constant 0.000000e+00 : f32
    %28 = vector.broadcast %cst_24 : f32 to vector<1x128xf32>
    %c0_25 = arith.constant 0 : index
    %c0_26 = arith.constant 0 : index
    %29 = vector.load %arg8[%c0_25, %c0_26] : memref<32x384xf32, #tpu.memory_space<vmem>>, vector<1x128xf32>
    tpu.vector_store %arg8[%c0_25, %c0_26], %28 {strides = array<i32>} : memref<32x384xf32, #tpu.memory_space<vmem>>, vector<1x128xf32>,
    %30 = vector.extract_strided_slice %27 {offsets = [0, 0], sizes = [15, 128], strides = [1, 1]} : vector<32x128xf32> to vector<15x128xf32>
    %c1_27 = arith.constant 1 : index
    %c0_28 = arith.constant 0 : index
    %31 = vector.load %arg8[%c1_27, %c0_28] : memref<32x384xf32, #tpu.memory_space<vmem>>, vector<15x128xf32>
    tpu.vector_store %arg8[%c1_27, %c0_28], %30 {strides = array<i32>} : memref<32x384xf32, #tpu.memory_space<vmem>>, vector<15x128xf32>,
    %cst_29 = arith.constant 0.000000e+00 : f32
    %32 = vector.broadcast %cst_29 : f32 to vector<1x128xf32>
    %c16_30 = arith.constant 16 : index
    %c0_31 = arith.constant 0 : index
    %33 = vector.load %arg8[%c16_30, %c0_31] : memref<32x384xf32, #tpu.memory_space<vmem>>, vector<1x128xf32>
    tpu.vector_store %arg8[%c16_30, %c0_31], %32 {strides = array<i32>} : memref<32x384xf32, #tpu.memory_space<vmem>>, vector<1x128xf32>,
    %34 = vector.extract_strided_slice %27 {offsets = [16, 0], sizes = [15, 128], strides = [1, 1]} : vector<32x128xf32> to vector<15x128xf32>
    %c17_32 = arith.constant 17 : index
    %c0_33 = arith.constant 0 : index
    %35 = vector.load %arg8[%c17_32, %c0_33] : memref<32x384xf32, #tpu.memory_space<vmem>>, vector<15x128xf32>
    tpu.vector_store %arg8[%c17_32, %c0_33], %34 {strides = array<i32>} : memref<32x384xf32, #tpu.memory_space<vmem>>, vector<15x128xf32>,
    %c0_34 = arith.constant 0 : index
    %c128_35 = arith.constant 128 : index
    %36 = vector.load %arg8[%c0_34, %c128_35] : memref<32x384xf32, #tpu.memory_space<vmem>>, vector<32x128xf32>
    tpu.vector_store %arg8[%c0_34, %c128_35], %27 {strides = array<i32>} : memref<32x384xf32, #tpu.memory_space<vmem>>, vector<32x128xf32>,
    %cst_36 = arith.constant 0.000000e+00 : f32
    %37 = vector.broadcast %cst_36 : f32 to vector<1x128xf32>
    %c15_37 = arith.constant 15 : index
    %c256 = arith.constant 256 : index
    %38 = vector.load %arg8[%c15_37, %c256] : memref<32x384xf32, #tpu.memory_space<vmem>>, vector<1x128xf32>
    tpu.vector_store %arg8[%c15_37, %c256], %37 {strides = array<i32>} : memref<32x384xf32, #tpu.memory_space<vmem>>, vector<1x128xf32>,
    %39 = vector.extract_strided_slice %27 {offsets = [1, 0], sizes = [15, 128], strides = [1, 1]} : vector<32x128xf32> to vector<15x128xf32>
    %c0_38 = arith.constant 0 : index
    %c256_39 = arith.constant 256 : index
    %40 = vector.load %arg8[%c0_38, %c256_39] : memref<32x384xf32, #tpu.memory_space<vmem>>, vector<15x128xf32>
    tpu.vector_store %arg8[%c0_38, %c256_39], %39 {strides = array<i32>} : memref<32x384xf32, #tpu.memory_space<vmem>>, vector<15x128xf32>,
    %cst_40 = arith.constant 0.000000e+00 : f32
    %41 = vector.broadcast %cst_40 : f32 to vector<1x128xf32>
    %c31_41 = arith.constant 31 : index
    %c256_42 = arith.constant 256 : index
    %42 = vector.load %arg8[%c31_41, %c256_42] : memref<32x384xf32, #tpu.memory_space<vmem>>, vector<1x128xf32>
    tpu.vector_store %arg8[%c31_41, %c256_42], %41 {strides = array<i32>} : memref<32x384xf32, #tpu.memory_space<vmem>>, vector<1x128xf32>,
    %43 = vector.extract_strided_slice %27 {offsets = [17, 0], sizes = [15, 128], strides = [1, 1]} : vector<32x128xf32> to vector<15x128xf32>
    %c16_43 = arith.constant 16 : index
    %c256_44 = arith.constant 256 : index
    %44 = vector.load %arg8[%c16_43, %c256_44] : memref<32x384xf32, #tpu.memory_space<vmem>>, vector<15x128xf32>
    tpu.vector_store %arg8[%c16_43, %c256_44], %43 {strides = array<i32>} : memref<32x384xf32, #tpu.memory_space<vmem>>, vector<15x128xf32>,
    %c0_45 = arith.constant 0 : index
    %c0_46 = arith.constant 0 : index
    %45 = vector.load %arg8[%c0_45, %c0_46] : memref<32x384xf32, #tpu.memory_space<vmem>>, vector<32x384xf32>
    %c0_47 = arith.constant 0 : index
    %c0_48 = arith.constant 0 : index
    %46 = vector.load %arg4[%c0_47, %c0_48] : memref<384x256xf32, #tpu.memory_space<vmem>>, vector<384x256xf32>
    %cst_49 = arith.constant dense<0.000000e+00> : vector<32x256xf32>
    %47 = tpu.matmul %45, %46, %cst_49 {dimension_numbers = #tpu.dot_dimension_numbers<[1], [0], [0], [1], [0, 0, 1, 1], [], []>} : vector<32x384xf32>, vector<384x256xf32>, vector<32x256xf32> -> vector<32x256xf32>
    %c0_50 = arith.constant 0 : index
    %c0_51 = arith.constant 0 : index
    %48 = vector.load %arg5[%c0_50, %c0_51] : memref<1x256xf32, #tpu.memory_space<vmem>>, vector<1x256xf32>
    %49 = vector.shape_cast %48 : vector<1x256xf32> to vector<1x256xf32>
    %50 = vector.broadcast %49 : vector<1x256xf32> to vector<32x256xf32>
    %51 = arith.addf %47, %50 : vector<32x256xf32>
    %cst_52 = arith.constant 0.000000e+00 : f32
    %52 = vector.broadcast %cst_52 : f32 to vector<32x256xf32>
    %53 = arith.maximumf %51, %52 : vector<32x256xf32>
    %c0_53 = arith.constant 0 : index
    %c0_54 = arith.constant 0 : index
    %54 = vector.load %arg6[%c0_53, %c0_54] : memref<32x256xf32, #tpu.memory_space<vmem>>, vector<32x256xf32>
    tpu.vector_store %arg6[%c0_53, %c0_54], %53 {strides = array<i32>} : memref<32x256xf32, #tpu.memory_space<vmem>>, vector<32x256xf32>,
    return
  }
  func.func @transform_0(%arg0: i32) -> (i32, i32, i32) {
    %c0_i32 = arith.constant 0 : i32
    %c0_i32_0 = arith.constant 0 : i32
    %c0_i32_1 = arith.constant 0 : i32
    return %arg0, %c0_i32, %c0_i32_0 : i32, i32, i32
  }
  func.func @transform_1(%arg0: i32) -> (i32, i32) {
    %c0_i32 = arith.constant 0 : i32
    %c0_i32_0 = arith.constant 0 : i32
    %c0_i32_1 = arith.constant 0 : i32
    return %c0_i32, %c0_i32_0 : i32, i32
  }
  func.func @transform_2(%arg0: i32) -> (i32, i32) {
    %c0_i32 = arith.constant 0 : i32
    %c0_i32_0 = arith.constant 0 : i32
    %c0_i32_1 = arith.constant 0 : i32
    return %c0_i32, %c0_i32_0 : i32, i32
  }
  func.func @transform_3(%arg0: i32) -> (i32, i32) {
    %c0_i32 = arith.constant 0 : i32
    %c0_i32_0 = arith.constant 0 : i32
    %c0_i32_1 = arith.constant 0 : i32
    return %c0_i32, %c0_i32_0 : i32, i32
  }
  func.func @transform_4(%arg0: i32) -> (i32, i32) {
    %c0_i32 = arith.constant 0 : i32
    %c0_i32_0 = arith.constant 0 : i32
    %c0_i32_1 = arith.constant 0 : i32
    return %c0_i32, %c0_i32_0 : i32, i32
  }
  func.func @transform_5(%arg0: i32) -> (i32, i32) {
    %c0_i32 = arith.constant 0 : i32
    %c0_i32_0 = arith.constant 0 : i32
    return %arg0, %c0_i32 : i32, i32
  }
}

</mosaic_0001>

<bundles_post_ra>
// kernel: _lambda_.1
= control target key start
LH: loop header
LB: loop body
LE: loop exit
PB: predicated region body
PF: predicated region fallthrough
CT: control target
= control target key end

     0   :  { %10 = vsyncpa [#allocation5], 0  ;;  %s779_s18 = smov [#allocation4]   ;;  %s985_s0 = inlined_call_operand.vmem [shape: f32[2,16,64], index: 0, kind: input, shape index: {}]   ;;  %s986_s1 = inlined_call_operand.vmem [shape: f32[192,128], index: 1, kind: input, shape index: {}]   ;;  %s987_s2 = inlined_call_operand.vmem [shape: f32[1,128], index: 2, kind: input, shape index: {}]   ;;  %s988_s3 = inlined_call_operand.hbm [shape: f32[384,256], index: 3, kind: input, shape index: {}]   ;;  %s989_s4 = inlined_call_operand.vmem [shape: f32[1,256], index: 4, kind: input, shape index: {}]   ;;  %s990_s5 = inlined_call_operand.vmem [shape: f32[32,256], index: 5, kind: output, shape index: {}]  }
   0x1   :  { %s22_s19 = sshll.u32 %s779_s18, 4  ;;  %s755_s22 = scalar_lea.hbm %s988_s3, 12288  ;;  %s23_s19 = int_to_ptr.vmem [resolvable:$true] %s22_s19 }
   0x2   :  { %p756_p0 = scmp.ne.s32.totalorder %s988_s3, %s755_s22  ;;  %p759_p1 = scmp.lt.u32.totalorder %s755_s22, %s988_s3 }
   0x4   :  { %p761_p2 = pnand %p759_p1, %p756_p0 }
   0x6   :  { %764 = shalt.err (!%p761_p2)
}
   0x7   :  { %s765_s27 = scalar_lea.vmem %s23_s19, 12288  ;;  %p770_p4 = scmp.lt.s32.totalorder %s23_s19, %s23_s19 }
   0x8   :  { %p766_p3 = scmp.ne.s32.totalorder %s23_s19, %s765_s27  ;;  %p771_p5 = scmp.lt.s32.totalorder %s765_s27, %s765_s27 }
   0xa   :  { %p772_p6 = por %p771_p5, %p770_p4 }
   0xc   :  { %p773_p7 = pnand %p772_p6, %p766_p3 }
   0xe   :  { %776 = shalt.err (!%p773_p7)
}
   0xf   :  { %s780_s28 = smov 256   ;;  %s781_s29 = smov 16  }
  0x10   :  { %28 = dma.hbm_to_vmem [thread:$0]  %s988_s3, 12288, %s23_s19, [#allocation5], %s780_s28, %s780_s28, %s781_s29  }
  0x11   :  { %777 = dma.done.wait [#allocation5], 12288  }
  0x12   :  { %778 = vsyncadd [#allocation5], 4294955008  ;;  %vm38_vm0 = vcmask 516096   ;;  %v782_v0 = vmov 0.0|0.0   ;;  %v783_v1 = vmov 0.0   ;;  %vm48_vm1 = vcmask 523265  }
  0x13   :  { %601 = vmatprep.subr.bf16.mxu0 %v782_v0  ;;  %39 = vst.msk [vmem:[#allocation2] sm:$0x1] %vm38_vm0, %v783_v1  ;;  %79 = vst.msk [vmem:[#allocation2 + $0x1f] sm:$0x1] %vm38_vm0, %v783_v1  ;;  %vm42_vm2 = vcmask 1040384   ;;  %v34_v2 = vld [vmem:[%s985_s0] sm:$0xff] }
  0x14   :  { %89 = vst.msk [vmem:[#allocation2 + $0x3f] sm:$0x1] %vm38_vm0, %v783_v1  ;;  %52 = vst.msk [vmem:[#allocation2 + $0x20] sm:$0x1] %vm38_vm0, %v783_v1  ;;  %v35_v3 = vld [vmem:[%s985_s0 + $0x8] sm:$0xff]  ;;  %vm50_vm3 = vcmask 523264  }
  0x15   :  { %237 = vst [vmem:[#allocation3] sm:$0x1] %v783_v1  ;;  %247 = vst [vmem:[#allocation3 + $0x30] sm:$0x1] %v783_v1  ;;  %vm80_vm4 = vcmask 1046528   ;;  %vm87_vm5 = vcmask 522240  }
  0x16   :  { %261 = vst [vmem:[#allocation3 + $0x2f] sm:$0x1] %v783_v1  ;;  %269 = vst [vmem:[#allocation3 + $0x5f] sm:$0x1] %v783_v1  ;;  %v36_v4 = vld [vmem:[%s985_s0 + $0x10] sm:$0xff]  ;;  %s784_s12 = smov 64  }
  0x17   :  { %62 = vrot.lane.b32.xlu0 %v34_v2, %s784_s12  ;;  %v43_v5 = vrot.slane %v34_v2, 7  ;;  %v81_v6 = vrot.slane %v34_v2, 1  ;;  %v44_v7 = vrot.slane %v35_v3, 7  ;;  %v82_v8 = vrot.slane %v35_v3, 1  ;;  %66 = vrot.lane.b32.xlu1 %v36_v4, %s784_s12  ;;  %v37_v9 = vld [vmem:[%s985_s0 + $0x18] sm:$0xff]  ;;  %v105_v10 = vld [vmem:[%s986_s1] sm:$0xff] }
  0x18   :  { %v55_v11 = vrot.slane %v36_v4, 7  ;;  %v90_v12 = vrot.slane %v36_v4, 1  ;;  %v56_v13 = vrot.slane %v37_v9, 7  ;;  %v91_v14 = vrot.slane %v37_v9, 1  ;;  %v106_v15 = vld [vmem:[%s986_s1 + $0x8] sm:$0xff]  ;;  %v107_v19 = vld [vmem:[%s986_s1 + $0x10] sm:$0xff] }
  0x19   :  { %49 = vst.msk [vmem:[#allocation2] sm:$0xfe] %vm48_vm1, %v43_v5  ;;  %v45_v16 = vsel %vm42_vm2, %v43_v5, %v44_v7  ;;  %v83_v17 = vsel %vm80_vm4, %v81_v6, %v82_v8  ;;  %v602_v18 = vpack.c.bf16 %v106_v15, %v105_v10  ;;  %v108_v20 = vld [vmem:[%s986_s1 + $0x18] sm:$0xff]  ;;  %v109_v24 = vld [vmem:[%s986_s1 + $0x20] sm:$0xff]  ;;  %v110_v25 = vld [vmem:[%s986_s1 + $0x28] sm:$0xff]  ;;  %vm74_vm6 = vcmask 1048064  }
  0x1a   :  { %88 = vst.msk [vmem:[#allocation2 + $0x18] sm:$0x7f] %vm87_vm5, %v82_v8  ;;  %96 = vst.msk [vmem:[#allocation2 + $0x38] sm:$0x7f] %vm87_vm5, %v91_v14  ;;  %v57_v21 = vsel %vm42_vm2, %v55_v11, %v56_v13  ;;  %v92_v22 = vsel %vm80_vm4, %v90_v12, %v91_v14  ;;  %v605_v23 = vpack.c.bf16 %v108_v20, %v107_v19  ;;  %v111_v27 = vld [vmem:[%s986_s1 + $0x30] sm:$0xff]  ;;  %v290_v28 = vld [vmem:[#allocation4 + $0x8] sm:$0xff] }
  0x1b   :  { %86 = vst.msk [vmem:[#allocation2 + $0x8] sm:$0xff] %vm50_vm3, %v83_v17  ;;  %51 = vst.msk [vmem:[#allocation2 + $0x10] sm:$0xff] %vm50_vm3, %v45_v16  ;;  %64 = vrot.lane.b32.xlu0 %v35_v3, %s784_s12  ;;  %68 = vrot.lane.b32.xlu1 %v37_v9, %s784_s12  ;;  %v608_v26 = vpack.c.bf16 %v110_v25, %v109_v24  ;;  %v112_v29 = vld [vmem:[%s986_s1 + $0x38] sm:$0xff]  ;;  %v289_v33 = vld [vmem:[#allocation4] sm:$0xff] }
  0x1c   :  { %60 = vst.msk [vmem:[#allocation2 + $0x20] sm:$0xfe] %vm48_vm1, %v55_v11  ;;  %603 = vmatpush1.bf16.msra.mxu0 %v602_v18  ;;  %v292_v31 = vld [vmem:[#allocation4 + $0x18] sm:$0xff]  ;;  %v291_v34 = vld [vmem:[#allocation4 + $0x10] sm:$0xff]  ;;  %v294_v36 = vld [vmem:[#allocation4 + $0x28] sm:$0xff]  ;;  %v611_v39 = vpack.c.bf16 %v112_v29, %v111_v27 }
  0x1d   :  { %95 = vst.msk [vmem:[#allocation2 + $0x28] sm:$0xff] %vm50_vm3, %v92_v22  ;;  %61 = vst.msk [vmem:[#allocation2 + $0x30] sm:$0xff] %vm50_vm3, %v57_v21  ;;  %604 = vmatprep.subr.bf16.mxu0 %v782_v0  ;;  %v637_v32 = vpack.c.bf16 %v292_v31, %v290_v28  ;;  %v639_v35 = vpack.c.bf16 %v291_v34, %v289_v33  ;;  %v296_v37 = vld [vmem:[#allocation4 + $0x38] sm:$0xff]  ;;  %v293_v38 = vld [vmem:[#allocation4 + $0x20] sm:$0xff] }
  0x1e   :  { %v641_v40 = vpack.c.bf16 %v296_v37, %v294_v36  ;;  %v295_v41 = vld [vmem:[#allocation4 + $0x30] sm:$0xff]  ;;  %v298_v42 = vld [vmem:[#allocation4 + $0x48] sm:$0xff]  ;;  %v300_v43 = vld [vmem:[#allocation4 + $0x58] sm:$0xff] }
  0x1f   :  { %638 = vmatprep.subr.bf16.mxu1 %v637_v32  ;;  %v113_v44 = vld [vmem:[%s986_s1 + $0x40] sm:$0xff]  ;;  %v114_v45 = vld [vmem:[%s986_s1 + $0x48] sm:$0xff]  ;;  %v643_v46 = vpack.c.bf16 %v295_v41, %v293_v38  ;;  %v645_v47 = vpack.c.bf16 %v300_v43, %v298_v42  ;;  %v299_v49 = vld [vmem:[#allocation4 + $0x50] sm:$0xff] }
  0x20   :  { %606 = vmatpush1.bf16.msra.mxu0 %v605_v23  ;;  %640 = vmatpush1.bf16.msra.mxu1 %v639_v35  ;;  %v297_v48 = vld [vmem:[#allocation4 + $0x40] sm:$0xff]  ;;  %v302_v50 = vld [vmem:[#allocation4 + $0x68] sm:$0xff]  ;;  %v304_v51 = vld [vmem:[#allocation4 + $0x78] sm:$0xff]  ;;  %v614_v52 = vpack.c.bf16 %v114_v45, %v113_v44 }
  0x21   :  { %607 = vmatprep.subr.bf16.mxu0 %v782_v0  ;;  %642 = vmatprep.subr.bf16.mxu1 %v641_v40  ;;  %v115_v53 = vld [vmem:[%s986_s1 + $0x50] sm:$0xff]  ;;  %v116_v54 = vld [vmem:[%s986_s1 + $0x58] sm:$0xff]  ;;  %v647_v55 = vpack.c.bf16 %v299_v49, %v297_v48  ;;  %v649_v56 = vpack.c.bf16 %v304_v51, %v302_v50  ;;  %v301_v57 = vld [vmem:[#allocation4 + $0x60] sm:$0xff] }
  0x22   :  { %v98_v30 = vld [vmem:[#allocation2 + $0x8] sm:$0xff]  ;;  %v303_v58 = vld [vmem:[#allocation4 + $0x70] sm:$0xff]  ;;  %v308_v60 = vld [vmem:[#allocation4 + $0x98] sm:$0xff]  ;;  %v617_v61 = vpack.c.bf16 %v116_v54, %v115_v53 }
  0x23   :  { %597 = vmatprep.mubr.msk.f32.mxu0 %vm50_vm3, %v98_v30  ;;  %v306_v59 = vld [vmem:[#allocation4 + $0x88] sm:$0xff]  ;;  %v117_v62 = vld [vmem:[%s986_s1 + $0x60] sm:$0xff]  ;;  %v651_v2 = vpack.c.bf16 %v303_v58, %v301_v57  ;;  %v307_v5 = vld [vmem:[#allocation4 + $0x90] sm:$0xff] }
  0x24   :  { %609 = vmatpush1.bf16.msra.mxu0 %v608_v26  ;;  %644 = vmatpush1.bf16.msra.mxu1 %v643_v46  ;;  %v118_v63 = vld [vmem:[%s986_s1 + $0x68] sm:$0xff]  ;;  %v653_v3 = vpack.c.bf16 %v308_v60, %v306_v59  ;;  %v305_v4 = vld [vmem:[#allocation4 + $0x80] sm:$0xff]  ;;  %v312_v7 = vld [vmem:[#allocation4 + $0xb8] sm:$0xff] }
  0x25   :  { %610 = vmatprep.subr.bf16.mxu0 %v782_v0  ;;  %646 = vmatprep.subr.bf16.mxu1 %v645_v47  ;;  %v310_v6 = vld [vmem:[#allocation4 + $0xa8] sm:$0xff]  ;;  %v620_v8 = vpack.c.bf16 %v118_v63, %v117_v62  ;;  %v119_v9 = vld [vmem:[%s986_s1 + $0x70] sm:$0xff]  ;;  %v120_v10 = vld [vmem:[%s986_s1 + $0x78] sm:$0xff]  ;;  %v655_v11 = vpack.c.bf16 %v307_v5, %v305_v4 }
  0x26   :  { %v657_v12 = vpack.c.bf16 %v312_v7, %v310_v6  ;;  %v309_v13 = vld [vmem:[#allocation4 + $0xa0] sm:$0xff]  ;;  %v311_v14 = vld [vmem:[#allocation4 + $0xb0] sm:$0xff]  ;;  %v314_v15 = vld [vmem:[#allocation4 + $0xc8] sm:$0xff]  ;;  %v623_v17 = vpack.c.bf16 %v120_v10, %v119_v9 }
  0x27   :  { %v316_v16 = vld [vmem:[#allocation4 + $0xd8] sm:$0xff]  ;;  %v121_v18 = vld [vmem:[%s986_s1 + $0x80] sm:$0xff]  ;;  %v122_v19 = vld [vmem:[%s986_s1 + $0x88] sm:$0xff]  ;;  %v659_v20 = vpack.c.bf16 %v311_v14, %v309_v13 }
  0x28   :  { %612 = vmatpush1.bf16.msra.mxu0 %v611_v39  ;;  %648 = vmatpush1.bf16.msra.mxu1 %v647_v55  ;;  %v661_v21 = vpack.c.bf16 %v316_v16, %v314_v15  ;;  %v313_v22 = vld [vmem:[#allocation4 + $0xc0] sm:$0xff]  ;;  %v315_v23 = vld [vmem:[#allocation4 + $0xd0] sm:$0xff]  ;;  %v318_v24 = vld [vmem:[#allocation4 + $0xe8] sm:$0xff]  ;;  %v626_v26 = vpack.c.bf16 %v122_v19, %v121_v18 }
  0x29   :  { %613 = vmatprep.subr.bf16.mxu0 %v782_v0  ;;  %650 = vmatprep.subr.bf16.mxu1 %v649_v56  ;;  %v320_v25 = vld [vmem:[#allocation4 + $0xf8] sm:$0xff]  ;;  %v123_v27 = vld [vmem:[%s986_s1 + $0x90] sm:$0xff]  ;;  %v663_v29 = vpack.c.bf16 %v315_v23, %v313_v22  ;;  %v317_v31 = vld [vmem:[#allocation4 + $0xe0] sm:$0xff] }
  0x2a   :  { %v124_v28 = vld [vmem:[%s986_s1 + $0x98] sm:$0xff]  ;;  %v665_v30 = vpack.c.bf16 %v320_v25, %v318_v24  ;;  %v319_v32 = vld [vmem:[#allocation4 + $0xf0] sm:$0xff]  ;;  %v322_v33 = vld [vmem:[#allocation4 + $0x108] sm:$0xff] }
  0x2b   :  { %v324_v34 = vld [vmem:[#allocation4 + $0x118] sm:$0xff]  ;;  %v629_v35 = vpack.c.bf16 %v124_v28, %v123_v27  ;;  %v125_v36 = vld [vmem:[%s986_s1 + $0xa0] sm:$0xff]  ;;  %v126_v37 = vld [vmem:[%s986_s1 + $0xa8] sm:$0xff]  ;;  %v667_v38 = vpack.c.bf16 %v319_v32, %v317_v31 }
  0x2c   :  { %615 = vmatpush1.bf16.msra.mxu0 %v614_v52  ;;  %652 = vmatpush1.bf16.msra.mxu1 %v651_v2  ;;  %v669_v39 = vpack.c.bf16 %v324_v34, %v322_v33  ;;  %v321_v40 = vld [vmem:[#allocation4 + $0x100] sm:$0xff]  ;;  %v323_v41 = vld [vmem:[#allocation4 + $0x110] sm:$0xff]  ;;  %v326_v42 = vld [vmem:[#allocation4 + $0x128] sm:$0xff]  ;;  %v632_v44 = vpack.c.bf16 %v126_v37, %v125_v36 }
  0x2d   :  { %616 = vmatprep.subr.bf16.mxu0 %v782_v0  ;;  %654 = vmatprep.subr.bf16.mxu1 %v653_v3  ;;  %v328_v43 = vld [vmem:[#allocation4 + $0x138] sm:$0xff]  ;;  %v127_v45 = vld [vmem:[%s986_s1 + $0xb0] sm:$0xff]  ;;  %v671_v47 = vpack.c.bf16 %v323_v41, %v321_v40  ;;  %v325_v48 = vld [vmem:[#allocation4 + $0x120] sm:$0xff] }
  0x2e   :  { %v128_v46 = vld [vmem:[%s986_s1 + $0xb8] sm:$0xff]  ;;  %v673_v49 = vpack.c.bf16 %v328_v43, %v326_v42  ;;  %v327_v50 = vld [vmem:[#allocation4 + $0x130] sm:$0xff]  ;;  %v354_v51 = vld [vmem:[#allocation4 + $0x208] sm:$0xff] }
  0x2f   :  { %v356_v52 = vld [vmem:[#allocation4 + $0x218] sm:$0xff]  ;;  %v330_v53 = vld [vmem:[#allocation4 + $0x148] sm:$0xff]  ;;  %v635_v55 = vpack.c.bf16 %v128_v46, %v127_v45  ;;  %v675_v56 = vpack.c.bf16 %v327_v50, %v325_v48  ;;  %v329_v59 = vld [vmem:[#allocation4 + $0x140] sm:$0xff] }
  0x30   :  { %618 = vmatpush1.bf16.msra.mxu0 %v617_v61  ;;  %656 = vmatpush1.bf16.msra.mxu1 %v655_v11  ;;  %v332_v54 = vld [vmem:[#allocation4 + $0x158] sm:$0xff]  ;;  %v701_v57 = vpack.c.bf16 %v356_v52, %v354_v51  ;;  %v331_v60 = vld [vmem:[#allocation4 + $0x150] sm:$0xff]  ;;  %v334_v61 = vld [vmem:[#allocation4 + $0x168] sm:$0xff] }
  0x31   :  { %619 = vmatprep.subr.bf16.mxu0 %v782_v0  ;;  %658 = vmatprep.subr.bf16.mxu1 %v657_v12  ;;  %v677_v58 = vpack.c.bf16 %v332_v54, %v330_v53  ;;  %v336_v62 = vld [vmem:[#allocation4 + $0x178] sm:$0xff]  ;;  %v679_v63 = vpack.c.bf16 %v331_v60, %v329_v59  ;;  %v333_v3 = vld [vmem:[#allocation4 + $0x160] sm:$0xff]  ;;  %v335_v4 = vld [vmem:[#allocation4 + $0x170] sm:$0xff] }
  0x32   :  { %v681_v2 = vpack.c.bf16 %v336_v62, %v334_v61  ;;  %v338_v5 = vld [vmem:[#allocation4 + $0x188] sm:$0xff]  ;;  %v340_v6 = vld [vmem:[#allocation4 + $0x198] sm:$0xff]  ;;  %v353_v10 = vld [vmem:[#allocation4 + $0x200] sm:$0xff] }
  0x33   :  { %v685_v7 = vpack.c.bf16 %v340_v6, %v338_v5  ;;  %v355_v11 = vld [vmem:[#allocation4 + $0x210] sm:$0xff]  ;;  %v358_v14 = vld [vmem:[#allocation4 + $0x228] sm:$0xff]  ;;  %v360_v15 = vld [vmem:[#allocation4 + $0x238] sm:$0xff] }
  0x34   :  { %621 = vmatpush1.bf16.msra.mxu0 %v620_v8  ;;  %660 = vmatpush1.bf16.msra.mxu1 %v659_v20  ;;  %v703_v16 = vpack.c.bf16 %v355_v11, %v353_v10  ;;  %v705_v18 = vpack.c.bf16 %v360_v15, %v358_v14  ;;  %v357_v19 = vld [vmem:[#allocation4 + $0x220] sm:$0xff]  ;;  %v359_v20 = vld [vmem:[#allocation4 + $0x230] sm:$0xff]  ;;  %v362_v22 = vld [vmem:[#allocation4 + $0x248] sm:$0xff] }
  0x35   :  { %622 = vmatprep.subr.bf16.mxu0 %v782_v0  ;;  %662 = vmatprep.subr.bf16.mxu1 %v661_v21  ;;  %v364_v23 = vld [vmem:[#allocation4 + $0x258] sm:$0xff]  ;;  %v707_v24 = vpack.c.bf16 %v359_v20, %v357_v19  ;;  %v102_v25 = vld [vmem:[#allocation2 + $0x28] sm:$0xff]  ;;  %v361_v27 = vld [vmem:[#allocation4 + $0x240] sm:$0xff] }
  0x36   :  { %v363_v28 = vld [vmem:[#allocation4 + $0x250] sm:$0xff]  ;;  %v104_v32 = vld [vmem:[#allocation2 + $0x38] sm:$0xff]  ;;  %v366_v34 = vld [vmem:[#allocation4 + $0x268] sm:$0xff] }
  0x37   :  { %v711_v31 = vpack.c.bf16 %v363_v28, %v361_v27  ;;  %v365_v37 = vld [vmem:[#allocation4 + $0x260] sm:$0xff]  ;;  %v370_v40 = vld [vmem:[#allocation4 + $0x288] sm:$0xff]  ;;  %v372_v41 = vld [vmem:[#allocation4 + $0x298] sm:$0xff] }
  0x38   :  { %624 = vmatpush1.bf16.msra.mxu0 %v623_v17  ;;  %664 = vmatpush1.bf16.msra.mxu1 %v663_v29  ;;  %v100_v17 = vld [vmem:[#allocation2 + $0x18] sm:$0xff]  ;;  %v717_v42 = vpack.c.bf16 %v372_v41, %v370_v40  ;;  %v369_v43 = vld [vmem:[#allocation4 + $0x280] sm:$0xff]  ;;  %v374_v48 = vld [vmem:[#allocation4 + $0x2a8] sm:$0xff] }
  0x39   :  { %625 = vmatprep.subr.bf16.mxu0 %v782_v0  ;;  %666 = vmatprep.subr.bf16.mxu1 %v665_v30  ;;  %v337_v46 = vld [vmem:[#allocation4 + $0x180] sm:$0xff]  ;;  %v376_v50 = vld [vmem:[#allocation4 + $0x2b8] sm:$0xff]  ;;  %v375_v52 = vld [vmem:[#allocation4 + $0x2b0] sm:$0xff] }
  0x3a   :  { %v373_v51 = vld [vmem:[#allocation4 + $0x2a0] sm:$0xff]  ;;  %v721_v53 = vpack.c.bf16 %v376_v50, %v374_v48  ;;  %v343_v59 = vld [vmem:[#allocation4 + $0x1b0] sm:$0xff]  ;;  %v378_v60 = vld [vmem:[#allocation4 + $0x2c8] sm:$0xff] }
  0x3b   :  { %v723_v54 = vpack.c.bf16 %v375_v52, %v373_v51  ;;  %v380_v62 = vld [vmem:[#allocation4 + $0x2d8] sm:$0xff]  ;;  %v346_v5 = vld [vmem:[#allocation4 + $0x1c8] sm:$0xff]  ;;  %v349_v19 = vld [vmem:[#allocation4 + $0x1e0] sm:$0xff] }
  0x3c   :  { %627 = vmatpush1.bf16.msra.mxu0 %v626_v26  ;;  %668 = vmatpush1.bf16.msra.mxu1 %v667_v38  ;;  %v709_v26 = vpack.c.bf16 %v364_v23, %v362_v22  ;;  %v367_v38 = vld [vmem:[#allocation4 + $0x270] sm:$0xff]  ;;  %v348_v6 = vld [vmem:[#allocation4 + $0x1d8] sm:$0xff]  ;;  %v596_v22 = vld [vmem:[%s987_s2] ss:$0 sm:$0xff] }
  0x3d   :  { %628 = vmatprep.subr.bf16.mxu0 %v782_v0  ;;  %670 = vmatprep.subr.bf16.mxu1 %v669_v39  ;;  %v715_v39 = vpack.c.bf16 %v367_v38, %v365_v37  ;;  %v384_v11 = vld [vmem:[#allocation4 + $0x2f8] sm:$0xff]  ;;  %v351_v20 = vld [vmem:[#allocation4 + $0x1f0] sm:$0xff] }
  0x40   :  { %630 = vmatpush1.bf16.msra.mxu0 %v629_v35  ;;  %672 = vmatpush1.bf16.msra.mxu1 %v671_v47  ;;  %v368_v35 = vld [vmem:[#allocation4 + $0x278] sm:$0xff]  ;;  %v339_v47 = vld [vmem:[#allocation4 + $0x190] sm:$0xff] }
  0x41   :  { %631 = vmatprep.subr.bf16.mxu0 %v782_v0  ;;  %674 = vmatprep.subr.bf16.mxu1 %v673_v49  ;;  %v713_v36 = vpack.c.bf16 %v368_v35, %v366_v34  ;;  %v687_v49 = vpack.c.bf16 %v339_v47, %v337_v46 }
  0x44   :  { %633 = vmatpush1.bf16.msra.mxu0 %v632_v44  ;;  %676 = vmatpush1.bf16.msra.mxu1 %v675_v56  ;;  %v371_v44 = vld [vmem:[#allocation4 + $0x290] sm:$0xff]  ;;  %v344_v56 = vld [vmem:[#allocation4 + $0x1b8] sm:$0xff] }
  0x45   :  { %634 = vmatprep.subr.bf16.mxu0 %v782_v0  ;;  %678 = vmatprep.subr.bf16.mxu1 %v677_v58  ;;  %v683_v0 = vpack.c.bf16 %v335_v4, %v333_v3  ;;  %v719_v45 = vpack.c.bf16 %v371_v44, %v369_v43  ;;  %v341_v58 = vld [vmem:[#allocation4 + $0x1a0] sm:$0xff]  ;;  %v725_v3 = vpack.c.bf16 %v380_v62, %v378_v60 }
  0x46   :  { %v691_v61 = vpack.c.bf16 %v343_v59, %v341_v58  ;;  %v385_v58 = vld [vmem:[%s989_s4] sm:$0x3] }
  0x48   :  { %636 = vmatpush1.bf16.msra.mxu0 %v635_v55  ;;  %680 = vmatpush1.bf16.msra.mxu1 %v679_v63  ;;  %v342_v55 = vld [vmem:[#allocation4 + $0x1a8] sm:$0xff]  ;;  %v377_v63 = vld [vmem:[#allocation4 + $0x2c0] sm:$0xff] }
  0x49   :  { %702 = vmatprep.subr.bf16.mxu0 %v701_v57  ;;  %682 = vmatprep.subr.bf16.mxu1 %v681_v2  ;;  %v689_v57 = vpack.c.bf16 %v344_v56, %v342_v55  ;;  %v379_v2 = vld [vmem:[#allocation4 + $0x2d0] sm:$0xff]  ;;  %v387_v55 = vlaneseq }
  0x4a   :  { %v727_v4 = vpack.c.bf16 %v379_v2, %v377_v63 }
  0x4b   :  { %v388_v56 = vshrl.u32 %v387_v55, 7 }
  0x4c   :  { %684 = vmatpush1.bf16.msra.mxu1 %v683_v0  ;;  %v693_v0 = vpack.c.bf16 %v348_v6, %v346_v5 }
  0x4d   :  { %686 = vmatprep.subr.bf16.mxu1 %v685_v7  ;;  %v345_v7 = vld [vmem:[#allocation4 + $0x1c0] sm:$0xff]  ;;  %v393_v59 = vsub.s32 1, %v388_v56 }
  0x4f   :  { %v394_v62 = vrot.slane %v385_v58, %v393_v59 }
  0x50   :  { %688 = vmatpush1.bf16.msra.mxu1 %v687_v49 }
  0x51   :  { %690 = vmatprep.subr.bf16.mxu1 %v689_v57  ;;  %v389_v57 = vsub.s32 0, %v388_v56 }
  0x53   :  { %v390_v60 = vrot.slane %v385_v58, %v389_v57 }
  0x54   :  { %692 = vmatpush1.bf16.msra.mxu1 %v691_v61 }
  0x55   :  { %694 = vmatprep.subr.bf16.mxu1 %v693_v0 }
  0x89   :  { %v63_v8 = vpop.permute.xlu0 %62  ;;  %v67_v9 = vpop.permute.xlu1 %66 }
  0x8a   :  { %75 = vst.msk [vmem:[#allocation2] sm:$0xff] %vm74_vm6, %v63_v8  ;;  %77 = vst.msk [vmem:[#allocation2 + $0x20] sm:$0xff] %vm74_vm6, %v67_v9  ;;  %v347_v8 = vld [vmem:[#allocation4 + $0x1d0] sm:$0xff]  ;;  %v382_v9 = vld [vmem:[#allocation4 + $0x2e8] sm:$0xff] }
  0x8b   :  { %v695_v10 = vpack.c.bf16 %v347_v8, %v345_v7  ;;  %v729_v14 = vpack.c.bf16 %v384_v11, %v382_v9 }
  0x8d   :  { %v65_v12 = vpop.permute.xlu0 %64  ;;  %v69_v13 = vpop.permute.xlu1 %68  ;;  %696 = vmatpush1.bf16.msra.mxu1 %v695_v10 }
  0x8e   :  { %76 = vst.msk [vmem:[#allocation2 + $0x10] sm:$0xff] %vm74_vm6, %v65_v12  ;;  %78 = vst.msk [vmem:[#allocation2 + $0x30] sm:$0xff] %vm74_vm6, %v69_v13  ;;  %v381_v12 = vld [vmem:[#allocation4 + $0x2e0] sm:$0xff]  ;;  %v383_v13 = vld [vmem:[#allocation4 + $0x2f0] sm:$0xff] }
  0x8f   :  { %v731_v15 = vpack.c.bf16 %v383_v13, %v381_v12 }
  0x91   :  { %v97_v21 = vld [vmem:[#allocation2] sm:$0xff] }
  0x92   :  { %213 = vmatmul.mubr.f32.vlgmr.msra.gmra.mrb[0].mxu0 %v97_v21  ;;  %v101_v30 = vld [vmem:[#allocation2 + $0x20] sm:$0xff]  ;;  %v699_v21 = vpack.c.bf16 %v351_v20, %v349_v19 }
  0x93   :  { %598 = vmatprep.mubr.msk.f32.mxu0 %vm50_vm3, %v100_v17  ;;  %704 = vmatpush1.bf16.msra.mxu0 %v703_v16  ;;  %v350_v16 = vld [vmem:[#allocation4 + $0x1e8] sm:$0xff]  ;;  %v352_v17 = vld [vmem:[#allocation4 + $0x1f8] sm:$0xff] }
  0x94   :  { %706 = vmatprep.subr.bf16.mxu0 %v705_v18  ;;  %v697_v18 = vpack.c.bf16 %v352_v17, %v350_v16 }
  0x95   :  { %v99_v29 = vld [vmem:[#allocation2 + $0x10] sm:$0xff] }
  0x96   :  { %218 = vmatmul.mubr.f32.gmra.mrb[2].mxu0 %v99_v29  ;;  %v103_v33 = vld [vmem:[#allocation2 + $0x30] sm:$0xff]  ;;  %698 = vmatprep.subr.bf16.mxu1 %v697_v18 }
  0x97   :  { %599 = vmatprep.mubr.msk.f32.mxu0 %vm50_vm3, %v102_v25  ;;  %708 = vmatpush1.bf16.msra.mxu0 %v707_v24 }
  0x98   :  { %710 = vmatprep.subr.bf16.mxu0 %v709_v26  ;;  %700 = vmatpush1.bf16.msra.mxu1 %v699_v21 }
  0x9a   :  { %223 = vmatmul.mubr.f32.gmra.mrb[4].mxu0 %v101_v30 }
  0x9b   :  { %600 = vmatprep.mubr.msk.f32.mxu0 %vm50_vm3, %v104_v32  ;;  %712 = vmatpush1.bf16.msra.mxu0 %v711_v31 }
  0x9c   :  { %714 = vmatprep.subr.bf16.mxu0 %v713_v36 }
  0x9e   :  { %228 = vmatmul.mubr.f32.gmra.mrb[6].mxu0 %v103_v33 }
  0x9f   :  { %550 = vmatprep.mubr.f32.mxu0 %v783_v1  ;;  %716 = vmatpush1.bf16.msra.mxu0 %v715_v39 }
  0xa0   :  { %718 = vmatprep.subr.bf16.mxu0 %v717_v42 }
  0xa3   :  { %720 = vmatpush1.bf16.msra.mxu0 %v719_v45 }
  0xa4   :  { %722 = vmatprep.subr.bf16.mxu0 %v721_v53 }
  0xa7   :  { %724 = vmatpush1.bf16.msra.mxu0 %v723_v54 }
  0xa8   :  { %726 = vmatprep.subr.bf16.mxu0 %v725_v3 }
  0xab   :  { %728 = vmatpush1.bf16.msra.mxu0 %v727_v4 }
  0xac   :  { %730 = vmatprep.subr.bf16.mxu0 %v729_v14 }
  0xaf   :  { %732 = vmatpush1.bf16.msra.mxu0 %v731_v15 }
 0x165   :  { %v214_v23 = vpop.f32.mrb[0].mxu0 }
 0x166   :  { %v215_v24 = vadd.f32 %v596_v22, %v214_v23  ;;  %v216_v25 = vpop.f32.mrb[1].mxu0 }
 0x168   :  { %v233_v26 = vmax.f32 %v215_v24, 0.0 }
 0x169   :  { %v219_v27 = vpop.f32.mrb[2].mxu0 }
 0x16a   :  { %v240_v28 = vrot.slane %v233_v26, 7  ;;  %v220_v29 = vadd.f32 %v596_v22, %v219_v27  ;;  %v221_v30 = vpop.f32.mrb[3].mxu0  ;;  %461 = vmatprep.mubr.f32.mxu1 %v233_v26  ;;  %v262_v33 = vrot.slane %v233_v26, 1 }
 0x16c   :  { %245 = vst [vmem:[#allocation3] sm:$0xfe] %v240_v28  ;;  %v234_v31 = vmax.f32 %v220_v29, 0.0 }
 0x16d   :  { %v224_v32 = vpop.f32.mrb[4].mxu0 }
 0x16e   :  { %v241_v34 = vrot.slane %v234_v31, 7  ;;  %v263_v35 = vrot.slane %v234_v31, 1  ;;  %v225_v36 = vadd.f32 %v596_v22, %v224_v32  ;;  %v226_v37 = vpop.f32.mrb[5].mxu0 }
 0x170   :  { %v242_v38 = vsel %vm42_vm2, %v240_v28, %v241_v34  ;;  %v264_v39 = vsel %vm80_vm4, %v262_v33, %v263_v35  ;;  %268 = vst [vmem:[#allocation3 + $0x28] sm:$0x7f] %v263_v35  ;;  %v235_v40 = vmax.f32 %v225_v36, 0.0 }
 0x171   :  { %v229_v41 = vpop.f32.mrb[6].mxu0  ;;  %551 = vmatmul.mubr.f32.vlgmr.msra.gmra.mrb[8].mxu0 %v264_v39 }
 0x172   :  { %v250_v42 = vrot.slane %v235_v40, 7  ;;  %v230_v43 = vadd.f32 %v596_v22, %v229_v41  ;;  %v231_v44 = vpop.f32.mrb[7].mxu0  ;;  %556 = vmatprep.mubr.f32.mxu0 %v783_v1  ;;  %v270_v47 = vrot.slane %v235_v40, 1 }
 0x173   :  { %v277_v45 = vld [vmem:[#allocation3] sm:$0xff] }
 0x174   :  { %255 = vst [vmem:[#allocation3 + $0x30] sm:$0xfe] %v250_v42  ;;  %v236_v46 = vmax.f32 %v230_v43, 0.0  ;;  %462 = vmatmul.mubr.f32.vlgmr.msra.gmra.mrb[0].mxu1 %v277_v45 }
 0x175   :  { %467 = vmatprep.mubr.f32.mxu1 %v234_v31 }
 0x176   :  { %v251_v48 = vrot.slane %v236_v46, 7  ;;  %v271_v49 = vrot.slane %v236_v46, 1 }
 0x177   :  { %v282_v50 = vld [vmem:[#allocation3 + $0x28] sm:$0xff] }
 0x178   :  { %v252_v51 = vsel %vm42_vm2, %v250_v42, %v251_v48  ;;  %v272_v52 = vsel %vm80_vm4, %v270_v47, %v271_v49  ;;  %276 = vst [vmem:[#allocation3 + $0x58] sm:$0x7f] %v271_v49  ;;  %468 = vmatmul.mubr.f32.gmra.mrb[2].mxu1 %v242_v38  ;;  %557 = vmatmul.mubr.f32.gmra.mrb[10].mxu0 %v282_v50 }
 0x179   :  { %473 = vmatprep.mubr.f32.mxu1 %v235_v40  ;;  %562 = vmatprep.mubr.f32.mxu0 %v783_v1 }
 0x17b   :  { %v283_v53 = vld [vmem:[#allocation3 + $0x30] sm:$0xff] }
 0x17c   :  { %474 = vmatmul.mubr.f32.gmra.mrb[4].mxu1 %v283_v53  ;;  %563 = vmatmul.mubr.f32.gmra.mrb[12].mxu0 %v272_v52 }
 0x17d   :  { %479 = vmatprep.mubr.f32.mxu1 %v236_v46  ;;  %568 = vmatprep.mubr.f32.mxu0 %v783_v1 }
 0x17f   :  { %v288_v54 = vld [vmem:[#allocation3 + $0x58] sm:$0xff] }
 0x180   :  { %480 = vmatmul.mubr.f32.gmra.mrb[6].mxu1 %v252_v51  ;;  %569 = vmatmul.mubr.f32.gmra.mrb[14].mxu0 %v288_v54 }
 0x244   :  { %v552_v61 = vpop.f32.mrb[8].mxu0 }
 0x245   :  { %v554_v63 = vpop.f32.mrb[9].mxu0 }
 0x247   :  { %v463_v2 = vpop.f32.mrb[0].mxu1 }
 0x248   :  { %v464_v3 = vadd.f32 %v463_v2, %v390_v60  ;;  %v465_v4 = vpop.f32.mrb[1].mxu1 }
 0x249   :  { %v466_v5 = vadd.f32 %v465_v4, %v394_v62 }
 0x24a   :  { %v553_v1 = vadd.f32 %v552_v61, %v464_v3 }
 0x24b   :  { %v469_v6 = vpop.f32.mrb[2].mxu1  ;;  %v555_v0 = vadd.f32 %v554_v63, %v466_v5  ;;  %v558_v7 = vpop.f32.mrb[10].mxu0 }
 0x24c   :  { %v470_v8 = vadd.f32 %v469_v6, %v390_v60  ;;  %v575_v9 = vmax.f32 %v553_v1, 0.0  ;;  %v471_v10 = vpop.f32.mrb[3].mxu1  ;;  %v560_v11 = vpop.f32.mrb[11].mxu0 }
 0x24d   :  { %v472_v12 = vadd.f32 %v471_v10, %v394_v62  ;;  %v576_v13 = vmax.f32 %v555_v0, 0.0 }
 0x24e   :  { %583 = vst [vmem:[%s990_s5] sm:$0xff] %v575_v9  ;;  %v559_v14 = vadd.f32 %v558_v7, %v470_v8 }
 0x24f   :  { %584 = vst [vmem:[%s990_s5 + $0x8] sm:$0xff] %v576_v13  ;;  %v475_v15 = vpop.f32.mrb[4].mxu1  ;;  %v561_v16 = vadd.f32 %v560_v11, %v472_v12  ;;  %v564_v17 = vpop.f32.mrb[12].mxu0 }
 0x250   :  { %v476_v18 = vadd.f32 %v475_v15, %v390_v60  ;;  %v577_v19 = vmax.f32 %v559_v14, 0.0  ;;  %v477_v20 = vpop.f32.mrb[5].mxu1  ;;  %v566_v21 = vpop.f32.mrb[13].mxu0 }
 0x251   :  { %v478_v22 = vadd.f32 %v477_v20, %v394_v62  ;;  %v578_v23 = vmax.f32 %v561_v16, 0.0 }
 0x252   :  { %585 = vst [vmem:[%s990_s5 + $0x10] sm:$0xff] %v577_v19  ;;  %v565_v24 = vadd.f32 %v564_v17, %v476_v18 }
 0x253   :  { %586 = vst [vmem:[%s990_s5 + $0x18] sm:$0xff] %v578_v23  ;;  %v481_v25 = vpop.f32.mrb[6].mxu1  ;;  %v567_v26 = vadd.f32 %v566_v21, %v478_v22  ;;  %v570_v27 = vpop.f32.mrb[14].mxu0 }
 0x254   :  { %v482_v28 = vadd.f32 %v481_v25, %v390_v60  ;;  %v579_v29 = vmax.f32 %v565_v24, 0.0  ;;  %v483_v30 = vpop.f32.mrb[7].mxu1  ;;  %v572_v31 = vpop.f32.mrb[15].mxu0 }
 0x255   :  { %v484_v32 = vadd.f32 %v483_v30, %v394_v62  ;;  %v580_v33 = vmax.f32 %v567_v26, 0.0 }
 0x256   :  { %587 = vst [vmem:[%s990_s5 + $0x20] sm:$0xff] %v579_v29  ;;  %v571_v34 = vadd.f32 %v570_v27, %v482_v28 }
 0x257   :  { %588 = vst [vmem:[%s990_s5 + $0x28] sm:$0xff] %v580_v33  ;;  %v573_v35 = vadd.f32 %v572_v31, %v484_v32 }
 0x258   :  { %v581_v36 = vmax.f32 %v571_v34, 0.0 }
 0x259   :  { %v582_v37 = vmax.f32 %v573_v35, 0.0 }
 0x25a   :  { %589 = vst [vmem:[%s990_s5 + $0x30] sm:$0xff] %v581_v36 }
 0x25b   :  { %590 = vst [vmem:[%s990_s5 + $0x38] sm:$0xff] %v582_v37 }
 0x25c   :  { %595 = vsyncpa [#allocation5], 1 }

</bundles_post_ra>
